<compile_context>
chip_gen: v7x
topology: tpu7x:2x2x1
jax: 0.10.0
libtpu: 0.0.40
codegen_flags: <defaults>
</compile_context>

<pallas_src>
import functools

import jax
import jax.numpy as jnp
from jax.experimental import pallas as pl
from jax.experimental.pallas import tpu as pltpu

LANE = 128
SUBLANE = 8


def _round_up(n, m):
    return ((n + m - 1) // m) * m


def mlp_kernel(x_ref, w1_ref, b1_ref, w2_ref, b2_ref, w3_ref, b3_ref, o_ref):
    # layer 1: linear -> (dropout p=0 / eval == identity) -> relu
    h1 = jnp.dot(x_ref[...], w1_ref[...], preferred_element_type=jnp.float32)
    h1 = jnp.maximum(h1 + b1_ref[...], 0.0).astype(w2_ref.dtype)
    # layer 2: linear -> (dropout identity) -> relu
    h2 = jnp.dot(h1, w2_ref[...], preferred_element_type=jnp.float32)
    h2 = jnp.maximum(h2 + b2_ref[...], 0.0).astype(w3_ref.dtype)
    # layer 3: linear (no activation)
    out = jnp.dot(h2, w3_ref[...], preferred_element_type=jnp.float32)
    o_ref[...] = (out + b3_ref[...]).astype(o_ref.dtype)
    # TODO(synk): training-mode dropout with p>0 would need pltpu.prng_seed + prng_random_bits masking.


@functools.partial(jax.jit, static_argnames=("out_size", "block_b"))
def net_forward(x, w1, b1, w2, b2, w3, b3, *, out_size, block_b=None):
    B, in_size = x.shape
    h_pad = w1.shape[1]
    out_pad = w3.shape[1]

    x = x.astype(jnp.bfloat16)

    # Batch tiling: a single tile for small batches (avoids per-step overhead on
    # 1-TC chips), 512-row tiles for large batches (keeps VMEM small and lets a
    # 2-TC chip (v7x) split the "parallel" batch axis across cores).
    B_min = _round_up(max(B, 1), SUBLANE)
    if block_b is None:
        block_b = B_min if B_min <= 512 else 512
    block_b = _round_up(block_b, SUBLANE)
    grid_b = pl.cdiv(B_min, block_b)
    B_pad = grid_b * block_b
    if B_pad != B:
        x = jnp.pad(x, ((0, B_pad - B), (0, 0)))  # handles B not divisible by block_b

    flops = 2 * B_pad * (in_size * h_pad + h_pad * h_pad + h_pad * out_pad)
    bytes_accessed = (
        x.size * x.dtype.itemsize
        + sum(int(a.size) * a.dtype.itemsize for a in (w1, b1, w2, b2, w3, b3))
        + B_pad * out_pad * 4
    )

    def batch_map(i):
        return (i, 0)

    def const_map(i):
        return (0, 0)

    out = pl.pallas_call(
        mlp_kernel,
        out_shape=jax.ShapeDtypeStruct((B_pad, out_pad), jnp.float32),
        grid_spec=pltpu.PrefetchScalarGridSpec(
            num_scalar_prefetch=0,
            grid=(grid_b,),
            in_specs=[
                pl.BlockSpec((block_b, in_size), batch_map),  # x tile (bf16)
                pl.BlockSpec((in_size, h_pad), const_map),    # w1 (bf16, lane-padded)
                pl.BlockSpec((1, h_pad), const_map),          # b1 (f32)
                pl.BlockSpec((h_pad, h_pad), const_map),      # w2
                pl.BlockSpec((1, h_pad), const_map),          # b2
                pl.BlockSpec((h_pad, out_pad), const_map),    # w3
                pl.BlockSpec((1, out_pad), const_map),        # b3
            ],
            out_specs=pl.BlockSpec((block_b, out_pad), batch_map),
        ),
        compiler_params=pltpu.CompilerParams(
            dimension_semantics=("parallel",),
        ),
        cost_estimate=pl.CostEstimate(
            flops=flops, transcendentals=0, bytes_accessed=bytes_accessed
        ),
    )(x, w1, b1, w2, b2, w3, b3)

    # Strip batch padding and lane padding outside the kernel (cheap XLA slice).
    return out[:B, :out_size]


def init_linear(key, fan_in, fan_out, fan_in_pad=None, fan_out_pad=None):
    """nn.Linear-style init U(-1/sqrt(fan_in), 1/sqrt(fan_in)); weight returned transposed as
    (fan_in, fan_out) and zero-padded to lane-dense shapes (exactly equivalent numerics)."""
    fan_in_pad = fan_in_pad or fan_in
    fan_out_pad = fan_out_pad or fan_out
    kw, kb = jax.random.split(key)
    bound = 1.0 / jnp.sqrt(jnp.float32(fan_in))
    w = jax.random.uniform(kw, (fan_in, fan_out), jnp.float32, -bound, bound)
    b = jax.random.uniform(kb, (1, fan_out), jnp.float32, -bound, bound)
    w = jnp.pad(w, ((0, fan_in_pad - fan_in), (0, fan_out_pad - fan_out)))
    b = jnp.pad(b, ((0, 0), (0, fan_out_pad - fan_out)))
    return w.astype(jnp.bfloat16), b  # weights bf16 for MXU, bias stays f32


if __name__ == "__main__":
    in_size, n_hidden, out_size = 4, 32, 4
    batch = 16
    h_pad = _round_up(n_hidden, LANE)    # 32  -> 128 lane-dense hidden
    out_pad = _round_up(out_size, LANE)  # 4   -> 128 lane-dense output store

    key = jax.random.PRNGKey(0)
    k_x, k1, k2, k3 = jax.random.split(key, 4)

    x = jax.random.normal(k_x, (batch, in_size), jnp.float32)
    w1, b1 = init_linear(k1, in_size, n_hidden, fan_out_pad=h_pad)
    w2, b2 = init_linear(k2, n_hidden, n_hidden, fan_in_pad=h_pad, fan_out_pad=h_pad)
    w3, b3 = init_linear(k3, n_hidden, out_size, fan_in_pad=h_pad, fan_out_pad=out_pad)

    out = net_forward(x, w1, b1, w2, b2, w3, b3, out_size=out_size)
    out = jax.block_until_ready(out)

    # Reference in plain JAX, mirroring the kernel's bf16-input / f32-accumulate math.
    f32 = jnp.float32
    xb = x.astype(jnp.bfloat16).astype(f32)
    h = jnp.maximum(xb @ w1.astype(f32) + b1, 0.0)
    h = jnp.maximum(h.astype(jnp.bfloat16).astype(f32) @ w2.astype(f32) + b2, 0.0)
    ref = (h.astype(jnp.bfloat16).astype(f32) @ w3.astype(f32) + b3)[:, :out_size]

    assert out.shape == (batch, out_size)
    assert jnp.allclose(out, ref, atol=1e-3, rtol=1e-3), float(jnp.max(jnp.abs(out - ref)))

    print("KERNEL_OK")
</pallas_src>

<mosaic_0001>
module attributes {stable_mosaic.version = 11 : i64} {
  func.func @mlp_kernel(%arg0: i32, %arg1: memref<16x4xbf16, #tpu.memory_space<vmem>>, %arg2: memref<4x128xbf16, #tpu.memory_space<vmem>>, %arg3: memref<1x128xf32, #tpu.memory_space<vmem>>, %arg4: memref<128x128xbf16, #tpu.memory_space<vmem>>, %arg5: memref<1x128xf32, #tpu.memory_space<vmem>>, %arg6: memref<128x128xbf16, #tpu.memory_space<vmem>>, %arg7: memref<1x128xf32, #tpu.memory_space<vmem>>, %arg8: memref<16x128xf32, #tpu.memory_space<vmem>>) attributes {dimension_semantics = [#tpu.dimension_semantics<parallel>], iteration_bounds = array<i64: 1>, scalar_prefetch = 0 : i64, scratch_operands = 0 : i64, tpu.core_type = #tpu.core_type<tc>, window_params = [{transform_indices = @transform_0, window_bounds = array<i64: 16, 4>}, {pipeline_mode = #tpu.pipeline_mode<synchronous>, transform_indices = @transform_1, window_bounds = array<i64: 4, 128>}, {pipeline_mode = #tpu.pipeline_mode<synchronous>, transform_indices = @transform_2, window_bounds = array<i64: 1, 128>}, {pipeline_mode = #tpu.pipeline_mode<synchronous>, transform_indices = @transform_3, window_bounds = array<i64: 128, 128>}, {pipeline_mode = #tpu.pipeline_mode<synchronous>, transform_indices = @transform_4, window_bounds = array<i64: 1, 128>}, {pipeline_mode = #tpu.pipeline_mode<synchronous>, transform_indices = @transform_5, window_bounds = array<i64: 128, 128>}, {pipeline_mode = #tpu.pipeline_mode<synchronous>, transform_indices = @transform_6, window_bounds = array<i64: 1, 128>}, {transform_indices = @transform_7, window_bounds = array<i64: 16, 128>}]} {
    %c0 = arith.constant 0 : index
    %c0_0 = arith.constant 0 : index
    %0 = vector.load %arg1[%c0, %c0_0] : memref<16x4xbf16, #tpu.memory_space<vmem>>, vector<16x4xbf16>
    %c0_1 = arith.constant 0 : index
    %c0_2 = arith.constant 0 : index
    %1 = vector.load %arg2[%c0_1, %c0_2] : memref<4x128xbf16, #tpu.memory_space<vmem>>, vector<4x128xbf16>
    %cst = arith.constant dense<0.000000e+00> : vector<16x128xf32>
    %2 = tpu.matmul %0, %1, %cst {dimension_numbers = #tpu.dot_dimension_numbers<[1], [0], [0], [1], [0, 0, 1, 1], [], []>} : vector<16x4xbf16>, vector<4x128xbf16>, vector<16x128xf32> -> vector<16x128xf32>
    %c0_3 = arith.constant 0 : index
    %c0_4 = arith.constant 0 : index
    %3 = vector.load %arg3[%c0_3, %c0_4] : memref<1x128xf32, #tpu.memory_space<vmem>>, vector<1x128xf32>
    %4 = vector.broadcast %3 : vector<1x128xf32> to vector<16x128xf32>
    %5 = arith.addf %2, %4 : vector<16x128xf32>
    %cst_5 = arith.constant 0.000000e+00 : f32
    %6 = vector.broadcast %cst_5 : f32 to vector<16x128xf32>
    %7 = arith.maximumf %5, %6 : vector<16x128xf32>
    %8 = arith.truncf %7 : vector<16x128xf32> to vector<16x128xbf16>
    %c0_6 = arith.constant 0 : index
    %c0_7 = arith.constant 0 : index
    %9 = vector.load %arg4[%c0_6, %c0_7] : memref<128x128xbf16, #tpu.memory_space<vmem>>, vector<128x128xbf16>
    %cst_8 = arith.constant dense<0.000000e+00> : vector<16x128xf32>
    %10 = tpu.matmul %8, %9, %cst_8 {dimension_numbers = #tpu.dot_dimension_numbers<[1], [0], [0], [1], [0, 0, 1, 1], [], []>} : vector<16x128xbf16>, vector<128x128xbf16>, vector<16x128xf32> -> vector<16x128xf32>
    %c0_9 = arith.constant 0 : index
    %c0_10 = arith.constant 0 : index
    %11 = vector.load %arg5[%c0_9, %c0_10] : memref<1x128xf32, #tpu.memory_space<vmem>>, vector<1x128xf32>
    %12 = vector.broadcast %11 : vector<1x128xf32> to vector<16x128xf32>
    %13 = arith.addf %10, %12 : vector<16x128xf32>
    %cst_11 = arith.constant 0.000000e+00 : f32
    %14 = vector.broadcast %cst_11 : f32 to vector<16x128xf32>
    %15 = arith.maximumf %13, %14 : vector<16x128xf32>
    %16 = arith.truncf %15 : vector<16x128xf32> to vector<16x128xbf16>
    %c0_12 = arith.constant 0 : index
    %c0_13 = arith.constant 0 : index
    %17 = vector.load %arg6[%c0_12, %c0_13] : memref<128x128xbf16, #tpu.memory_space<vmem>>, vector<128x128xbf16>
    %cst_14 = arith.constant dense<0.000000e+00> : vector<16x128xf32>
    %18 = tpu.matmul %16, %17, %cst_14 {dimension_numbers = #tpu.dot_dimension_numbers<[1], [0], [0], [1], [0, 0, 1, 1], [], []>} : vector<16x128xbf16>, vector<128x128xbf16>, vector<16x128xf32> -> vector<16x128xf32>
    %c0_15 = arith.constant 0 : index
    %c0_16 = arith.constant 0 : index
    %19 = vector.load %arg7[%c0_15, %c0_16] : memref<1x128xf32, #tpu.memory_space<vmem>>, vector<1x128xf32>
    %20 = vector.broadcast %19 : vector<1x128xf32> to vector<16x128xf32>
    %21 = arith.addf %18, %20 : vector<16x128xf32>
    %c0_17 = arith.constant 0 : index
    %c0_18 = arith.constant 0 : index
    %22 = vector.load %arg8[%c0_17, %c0_18] : memref<16x128xf32, #tpu.memory_space<vmem>>, vector<16x128xf32>
    tpu.vector_store %arg8[%c0_17, %c0_18], %21 {strides = array<i32>} : memref<16x128xf32, #tpu.memory_space<vmem>>, vector<16x128xf32>,
    return
  }
  func.func @transform_0(%arg0: i32) -> (i32, i32) {
    %c0_i32 = arith.constant 0 : i32
    %c0_i32_0 = arith.constant 0 : i32
    return %arg0, %c0_i32 : i32, i32
  }
  func.func @transform_1(%arg0: i32) -> (i32, i32) {
    %c0_i32 = arith.constant 0 : i32
    %c0_i32_0 = arith.constant 0 : i32
    %c0_i32_1 = arith.constant 0 : i32
    return %c0_i32, %c0_i32_0 : i32, i32
  }
  func.func @transform_2(%arg0: i32) -> (i32, i32) {
    %c0_i32 = arith.constant 0 : i32
    %c0_i32_0 = arith.constant 0 : i32
    %c0_i32_1 = arith.constant 0 : i32
    return %c0_i32, %c0_i32_0 : i32, i32
  }
  func.func @transform_3(%arg0: i32) -> (i32, i32) {
    %c0_i32 = arith.constant 0 : i32
    %c0_i32_0 = arith.constant 0 : i32
    %c0_i32_1 = arith.constant 0 : i32
    return %c0_i32, %c0_i32_0 : i32, i32
  }
  func.func @transform_4(%arg0: i32) -> (i32, i32) {
    %c0_i32 = arith.constant 0 : i32
    %c0_i32_0 = arith.constant 0 : i32
    %c0_i32_1 = arith.constant 0 : i32
    return %c0_i32, %c0_i32_0 : i32, i32
  }
  func.func @transform_5(%arg0: i32) -> (i32, i32) {
    %c0_i32 = arith.constant 0 : i32
    %c0_i32_0 = arith.constant 0 : i32
    %c0_i32_1 = arith.constant 0 : i32
    return %c0_i32, %c0_i32_0 : i32, i32
  }
  func.func @transform_6(%arg0: i32) -> (i32, i32) {
    %c0_i32 = arith.constant 0 : i32
    %c0_i32_0 = arith.constant 0 : i32
    %c0_i32_1 = arith.constant 0 : i32
    return %c0_i32, %c0_i32_0 : i32, i32
  }
  func.func @transform_7(%arg0: i32) -> (i32, i32) {
    %c0_i32 = arith.constant 0 : i32
    %c0_i32_0 = arith.constant 0 : i32
    return %arg0, %c0_i32 : i32, i32
  }
}

</mosaic_0001>

<bundles_post_ra>
// kernel: net_forward.1
= control target key start
LH: loop header
LB: loop body
LE: loop exit
PB: predicated region body
PF: predicated region fallthrough
CT: control target
= control target key end

     0   :  { %12 = vsyncpa [#allocation3], 0  ;;  %s629_s0 = inlined_call_operand.vmem [shape: bf16[16,4], index: 0, kind: input, shape index: {}]   ;;  %s630_s1 = inlined_call_operand.vmem [shape: bf16[4,128], index: 1, kind: input, shape index: {}]   ;;  %s631_s2 = inlined_call_operand.vmem [shape: f32[1,128], index: 2, kind: input, shape index: {}]   ;;  %s632_s3 = inlined_call_operand.hbm [shape: bf16[128,128], index: 3, kind: input, shape index: {}]   ;;  %s633_s4 = inlined_call_operand.vmem [shape: f32[1,128], index: 4, kind: input, shape index: {}]   ;;  %s634_s5 = inlined_call_operand.hbm [shape: bf16[128,128], index: 5, kind: input, shape index: {}]   ;;  %s635_s6 = inlined_call_operand.vmem [shape: f32[1,128], index: 6, kind: input, shape index: {}]   ;;  %s636_s7 = inlined_call_operand.vmem [shape: f32[16,128], index: 7, kind: output, shape index: {}]  }
   0x1   :  { %13 = vsyncpa [#allocation5], 0  ;;  %s515_s24 = smov [#allocation2]   ;;  %s467_s28 = scalar_lea.hbm %s632_s3, 1024 }
   0x2   :  { %s25_s25 = sshll.u32 %s515_s24, 4  ;;  %p468_p0 = scmp.ne.s32.totalorder %s632_s3, %s467_s28  ;;  %s26_s25 = int_to_ptr.vmem [resolvable:$true] %s25_s25 }
   0x3   :  { %p471_p1 = scmp.lt.u32.totalorder %s467_s28, %s632_s3 }
   0x5   :  { %p473_p2 = pnand %p471_p1, %p468_p0 }
   0x7   :  { %476 = shalt.err (!%p473_p2)
}
   0x8   :  { %s477_s10 = scalar_lea.vmem %s26_s25, 1024  ;;  %p482_p4 = scmp.lt.s32.totalorder %s26_s25, %s26_s25 }
   0x9   :  { %p478_p3 = scmp.ne.s32.totalorder %s26_s25, %s477_s10  ;;  %p483_p5 = scmp.lt.s32.totalorder %s477_s10, %s477_s10 }
   0xb   :  { %p484_p6 = por %p483_p5, %p482_p4 }
   0xd   :  { %p485_p7 = pnand %p484_p6, %p478_p3 }
   0xf   :  { %488 = shalt.err (!%p485_p7)
}
  0x10   :  { %s516_s11 = smov 64   ;;  %s517_s12 = smov 4  }
  0x11   :  { %31 = dma.hbm_to_vmem [thread:$0]  %s632_s3, 1024, %s26_s25, [#allocation3], %s516_s11, %s516_s11, %s517_s12  }
  0x12   :  { %s518_s15 = smov [#allocation4]   ;;  %s489_s19 = scalar_lea.hbm %s634_s5, 1024 }
  0x13   :  { %s39_s16 = sshll.u32 %s518_s15, 4  ;;  %p490_p8 = scmp.ne.s32.totalorder %s634_s5, %s489_s19  ;;  %s40_s16 = int_to_ptr.vmem [resolvable:$true] %s39_s16 }
  0x14   :  { %p493_p9 = scmp.lt.u32.totalorder %s489_s19, %s634_s5 }
  0x16   :  { %p495_p10 = pnand %p493_p9, %p490_p8 }
  0x18   :  { %498 = shalt.err (!%p495_p10)
}
  0x19   :  { %s499_s24 = scalar_lea.vmem %s40_s16, 1024  ;;  %p504_p12 = scmp.lt.s32.totalorder %s40_s16, %s40_s16 }
  0x1a   :  { %p500_p11 = scmp.ne.s32.totalorder %s40_s16, %s499_s24  ;;  %p505_p13 = scmp.lt.s32.totalorder %s499_s24, %s499_s24 }
  0x1c   :  { %p506_p0 = por %p505_p13, %p504_p12 }
  0x1e   :  { %p507_p1 = pnand %p506_p0, %p500_p11 }
  0x20   :  { %510 = shalt.err (!%p507_p1)
}
  0x21   :  { %45 = dma.hbm_to_vmem [thread:$0]  %s634_s5, 1024, %s40_s16, [#allocation5], %s516_s11, %s516_s11, %s517_s12  }
  0x22   :  { %511 = dma.done.wait [#allocation3], 1024  }
  0x23   :  { %512 = vsyncadd [#allocation3], 4294966272 }
  0x24   :  { %513 = dma.done.wait [#allocation5], 1024  }
  0x25   :  { %514 = vsyncadd [#allocation5], 4294966272  ;;  %v519_v0 = vmov 0.0   ;;  %vm520_vm0 = vmmov 0   ;;  %vm74_vm1 = vcmask 1041408   ;;  %v450_v3 = vld [vmem:[%s629_s0] sm:$0xff]  }
  0x26   :  { %398 = vmatprep.subr.bf16.mxu0 %v519_v0  ;;  %400 = vmatprep.mubr.msk.bf16.mxu0 %vm520_vm0, %v519_v0  ;;  %v57_v1 = vld [vmem:[%s630_s1] sm:$0x3]  ;;  %vm70_vm2 = vcmask 31744   ;;  %v452_v5 = vld [vmem:[#allocation2 + $0x8] sm:$0xff]   ;;  %v453_v6 = vld [vmem:[#allocation2 + $0x10] sm:$0xff]  }
  0x27   :  { %404 = vmatprep.subr.bf16.mxu1 %v519_v0  ;;  %420 = vmatprep.mubr.msk.bf16.mxu1 %vm520_vm0, %v519_v0  ;;  %v76_v2 = vsel %vm74_vm1, %v57_v1, 0  ;;  %v451_v4 = vld [vmem:[#allocation2] sm:$0xff]   ;;  %v454_v7 = vld [vmem:[#allocation2 + $0x18] sm:$0xff]   ;;  %v456_v9 = vld [vmem:[#allocation2 + $0x28] sm:$0xff]  }
  0x28   :  { %399 = vmatpush3.bf16.msra.mxu0 %v76_v2  ;;  %405 = vmatpush3.bf16.msra.mxu1 %v451_v4  ;;  %v455_v8 = vld [vmem:[#allocation2 + $0x20] sm:$0xff]   ;;  %v457_v10 = vld [vmem:[#allocation2 + $0x30] sm:$0xff]   ;;  %v458_v11 = vld [vmem:[#allocation2 + $0x38] sm:$0xff]  }
  0x29   :  { %424 = vmatprep.subr.bf16.mxu0 %v519_v0  ;;  %406 = vmatprep.subr.bf16.mxu1 %v519_v0  ;;  %v459_v12 = vld [vmem:[#allocation4] sm:$0xff]   ;;  %v460_v13 = vld [vmem:[#allocation4 + $0x8] sm:$0xff]   ;;  %v461_v14 = vld [vmem:[#allocation4 + $0x10] sm:$0xff]  }
  0x2a   :  { %v462_v15 = vld [vmem:[#allocation4 + $0x18] sm:$0xff]   ;;  %v463_v16 = vld [vmem:[#allocation4 + $0x20] sm:$0xff]   ;;  %v464_v17 = vld [vmem:[#allocation4 + $0x28] sm:$0xff]  }
  0x2b   :  { %401 = vmatmul.mubr.msk.bf16.vlgmr.msra.gmra.mrb[0].mxu0 %vm70_vm2, %v450_v3  ;;  %v357_v18 = vld [vmem:[%s631_s2] ss:$0 sm:$0xff]  ;;  %v465_v28 = vld [vmem:[#allocation4 + $0x30] sm:$0xff]   ;;  %v466_v29 = vld [vmem:[#allocation4 + $0x38] sm:$0xff]  }
  0x2c   :  { %440 = vmatprep.mubr.msk.bf16.mxu0 %vm520_vm0, %v519_v0  ;;  %407 = vmatpush3.bf16.msra.mxu1 %v452_v5  ;;  %v360_v30 = vld [vmem:[%s633_s4] ss:$0 sm:$0xff] }
  0x2d   :  { %408 = vmatprep.subr.bf16.mxu1 %v519_v0  ;;  %425 = vmatpush3.bf16.msra.mxu0 %v459_v12  ;;  %v369_v40 = vld [vmem:[%s635_s6] ss:$0 sm:$0xff] }
  0x2e   :  { %426 = vmatprep.subr.bf16.mxu0 %v519_v0 }
  0x30   :  { %409 = vmatpush3.bf16.msra.mxu1 %v453_v6 }
  0x31   :  { %410 = vmatprep.subr.bf16.mxu1 %v519_v0  ;;  %427 = vmatpush3.bf16.msra.mxu0 %v460_v13 }
  0x32   :  { %428 = vmatprep.subr.bf16.mxu0 %v519_v0 }
  0x34   :  { %411 = vmatpush3.bf16.msra.mxu1 %v454_v7 }
  0x35   :  { %412 = vmatprep.subr.bf16.mxu1 %v519_v0  ;;  %429 = vmatpush3.bf16.msra.mxu0 %v461_v14 }
  0x36   :  { %430 = vmatprep.subr.bf16.mxu0 %v519_v0 }
  0x38   :  { %413 = vmatpush3.bf16.msra.mxu1 %v455_v8 }
  0x39   :  { %414 = vmatprep.subr.bf16.mxu1 %v519_v0  ;;  %431 = vmatpush3.bf16.msra.mxu0 %v462_v15 }
  0x3a   :  { %432 = vmatprep.subr.bf16.mxu0 %v519_v0 }
  0x3c   :  { %415 = vmatpush3.bf16.msra.mxu1 %v456_v9 }
  0x3d   :  { %416 = vmatprep.subr.bf16.mxu1 %v519_v0  ;;  %433 = vmatpush3.bf16.msra.mxu0 %v463_v16 }
  0x3e   :  { %434 = vmatprep.subr.bf16.mxu0 %v519_v0 }
  0x40   :  { %417 = vmatpush3.bf16.msra.mxu1 %v457_v10 }
  0x41   :  { %418 = vmatprep.subr.bf16.mxu1 %v519_v0  ;;  %435 = vmatpush3.bf16.msra.mxu0 %v464_v17 }
  0x42   :  { %436 = vmatprep.subr.bf16.mxu0 %v519_v0 }
  0x44   :  { %419 = vmatpush3.bf16.msra.mxu1 %v458_v11 }
  0x45   :  { %437 = vmatpush3.bf16.msra.mxu0 %v465_v28 }
  0x46   :  { %438 = vmatprep.subr.bf16.mxu0 %v519_v0 }
  0x49   :  { %439 = vmatpush3.bf16.msra.mxu0 %v466_v29 }
  0xfe   :  { %v112_v19 = vpop.f32.mrb[0].mxu0 }
  0xff   :  { %v113_v20 = vadd.f32 %v357_v18, %v112_v19  ;;  %v402_v21 = vpop.f32.mrb[1].mxu0 }
 0x100   :  { %v115_v22 = vpop.f32.mrb[2].mxu0 }
 0x101   :  { %v116_v23 = vadd.f32 %v357_v18, %v115_v22  ;;  %v403_v24 = vpop.f32.mrb[3].mxu0  ;;  %v119_v25 = vmax.f32 %v113_v20, 0.0 }
 0x103   :  { %v120_v26 = vmax.f32 %v116_v23, 0.0 }
 0x105   :  { %v121_v27 = vpack.c.bf16 %v120_v26, %v119_v25 }
 0x107   :  { %421 = vmatmul.mubr.bf16.vlgmr.msra.gmra.mrb[0].mxu1 %v121_v27 }
 0x1da   :  { %v227_v31 = vpop.f32.mrb[0].mxu1 }
 0x1db   :  { %v228_v32 = vadd.f32 %v360_v30, %v227_v31  ;;  %v422_v33 = vpop.f32.mrb[1].mxu1 }
 0x1dc   :  { %v230_v34 = vpop.f32.mrb[2].mxu1 }
 0x1dd   :  { %v231_v35 = vadd.f32 %v360_v30, %v230_v34  ;;  %v423_v36 = vpop.f32.mrb[3].mxu1  ;;  %v234_v37 = vmax.f32 %v228_v32, 0.0 }
 0x1df   :  { %v235_v38 = vmax.f32 %v231_v35, 0.0 }
 0x1e1   :  { %v236_v39 = vpack.c.bf16 %v235_v38, %v234_v37 }
 0x1e3   :  { %441 = vmatmul.mubr.bf16.vlgmr.msra.gmra.mrb[4].mxu0 %v236_v39 }
 0x2b6   :  { %v342_v41 = vpop.f32.mrb[4].mxu0 }
 0x2b7   :  { %v343_v42 = vadd.f32 %v369_v40, %v342_v41  ;;  %v442_v43 = vpop.f32.mrb[5].mxu0 }
 0x2b8   :  { %v345_v44 = vpop.f32.mrb[6].mxu0 }
 0x2b9   :  { %349 = vst [vmem:[%s636_s7] sm:$0xff] %v343_v42  ;;  %v346_v45 = vadd.f32 %v369_v40, %v345_v44  ;;  %v443_v46 = vpop.f32.mrb[7].mxu0 }
 0x2bb   :  { %350 = vst [vmem:[%s636_s7 + $0x8] sm:$0xff] %v346_v45 }
 0x2bc   :  { %355 = vsyncpa [#allocation3], 1 }
 0x2bd   :  { %356 = vsyncpa [#allocation5], 1 }

</bundles_post_ra>
